<compile_context>
chip_gen: v5e
topology: v5e:2x2
jax: 0.10.0
libtpu: 0.0.40
codegen_flags: <defaults>
</compile_context>

<pallas_src>
import jax
import jax.numpy as jnp
from jax.experimental import pallas as pl
from jax.experimental.pallas import tpu as pltpu


def grouped_fc_kernel(x_ref, w_ref, b_ref, o_ref):
    # x_ref: (TB, G*L) ; w_ref: (G*L, G) ; b_ref: (1, G) ; o_ref: (TB, G)
    acc = jnp.dot(
        x_ref[...],
        w_ref[...],
        preferred_element_type=jnp.float32,
        precision=jax.lax.Precision.HIGHEST,
    )
    o_ref[...] = (acc + b_ref[...].astype(jnp.float32)).astype(o_ref.dtype)


def make_grouped_fc_params(weight, bias, compute_dtype=None):
    """Precompute the block-diagonal selector weight and 2-D bias.

    weight: (1, L, G), bias: (G,).  Call once per parameter update and reuse
    across forward calls (hoists the transpose/where out of the hot path).
    """
    _, L, G = weight.shape
    GL = G * L
    dtype = compute_dtype if compute_dtype is not None else weight.dtype

    # W_sel[g*L + l, g] = weight[0, l, g]
    w_gl = jnp.transpose(weight[0], (1, 0)).reshape(GL)            # (GL,)
    group_ids = jnp.repeat(jnp.arange(G), L)                       # (GL,)
    sel = group_ids[:, None] == jnp.arange(G)[None, :]             # (GL, G)
    w_sel = jnp.where(sel, w_gl[:, None], 0.0).astype(dtype)       # (GL, G)

    b2d = bias.reshape(1, G).astype(dtype)                         # (1, G)
    return w_sel, b2d


def _choose_tb(B, tb_max):
    """Batch-tile rows per grid step.

    - multiple of 8 (f32 sublane tiling; also a multiple of 16 for bf16 when
      tb_max is, which the default 4096 is),
    - never a single grid step when B > 8 (so v7x can shard the parallel axis
      across both TensorCores and the pipeliner has >=2 steps to overlap),
    - capped at tb_max (VMEM budget).
    """
    if B <= 8:
        return B
    min_steps = 4 if B >= 64 else 2
    tb = -(-B // min_steps)          # cdiv(B, min_steps)
    tb = ((tb + 7) // 8) * 8         # round up to multiple of 8
    return max(8, min(tb, tb_max))


def grouped_fc_apply(x, w_sel, b2d, *, tb_max=4096):
    """x: (B, G, L) with precomputed (w_sel, b2d) -> (B, G)."""
    B, G, L = x.shape
    GL = G * L
    compute_dtype = w_sel.dtype
    out_dtype = x.dtype

    # Lane-dense input: flatten (g, l) -> g*L + l (free, contiguous reshape).
    x_flat = x.reshape(B, GL).astype(compute_dtype)

    TB = _choose_tb(B, tb_max)
    grid = (pl.cdiv(B, TB),)

    # VMEM budget (double-buffered): x block + lane-padded (TB,128) output
    # block + resident weight/bias (also lane-padded).  2x headroom, clamped
    # to stay well under v7x's 64 MiB physical VMEM.
    itemsize = jnp.dtype(compute_dtype).itemsize
    out_itemsize = jnp.dtype(out_dtype).itemsize
    needed = 2 * (
        TB * GL * itemsize            # x block
        + TB * 128 * out_itemsize     # output block, lane-padded 8 -> 128
        + GL * 128 * itemsize         # weight, lane-padded
        + 8 * 128 * itemsize          # bias, padded
    )
    vmem_limit = int(min(max(2 * needed, 16 * 1024 * 1024), 48 * 1024 * 1024))

    cost = pl.CostEstimate(
        flops=2 * B * GL * G,
        transcendentals=0,
        bytes_accessed=(
            B * GL * itemsize + GL * G * itemsize + G * itemsize
            + B * G * out_itemsize
        ),
    )

    return pl.pallas_call(
        grouped_fc_kernel,
        out_shape=jax.ShapeDtypeStruct((B, G), out_dtype),
        grid=grid,
        in_specs=[
            pl.BlockSpec((TB, GL), lambda i: (i, 0)),   # x: tiled over batch
            pl.BlockSpec((GL, G), lambda i: (0, 0)),    # weight: resident
            pl.BlockSpec((1, G), lambda i: (0, 0)),     # bias: resident
        ],
        out_specs=pl.BlockSpec((TB, G), lambda i: (i, 0)),
        compiler_params=pltpu.CompilerParams(
            # Batch axis is embarrassingly parallel -> v7x shards the grid
            # across both TensorCores; harmless on v5e/v6e.
            dimension_semantics=("parallel",),
            vmem_limit_bytes=vmem_limit,
        ),
        cost_estimate=cost,
    )(x_flat, w_sel, b2d)


def grouped_fc_forward(x, weight, bias, *, tb_max=4096, compute_dtype=None):
    """Convenience wrapper: x: (B, G, L), weight: (1, L, G), bias: (G,) -> (B, G).

    Computes diagonal(matmul(x, weight) + bias) without the (B, G, G)
    intermediate.  For hot loops prefer make_grouped_fc_params + grouped_fc_apply
    so the selector weight is built once per parameter update.
    Set compute_dtype=jnp.bfloat16 to halve HBM read bytes (f32 accumulation).
    """
    w_sel, b2d = make_grouped_fc_params(weight, bias, compute_dtype)
    return grouped_fc_apply(x, w_sel, b2d, tb_max=tb_max)


if __name__ == "__main__":
    # Small shapes consistent with the module: bias has 8 entries -> num_groups = 8.
    B = 16            # batch (TB=8 -> grid=(2,): exercises the multi-step pipeline)
    G = 8             # num_groups (fixed by bias shape (8,))
    L = 32            # input_length

    key = jax.random.PRNGKey(0)
    kx, kw, kb = jax.random.split(key, 3)

    # Deterministic parameter init mirroring __init__:
    #   kaiming_normal_ on a (1, L, G) tensor: fan_in = L * G, gain = sqrt(2)
    std = (2.0 / (L * G)) ** 0.5
    weight = jax.random.normal(kw, (1, L, G), dtype=jnp.float32) * std
    bias = jax.random.uniform(kb, (G,), dtype=jnp.float32) - 0.5

    x = jax.random.normal(kx, (B, G, L), dtype=jnp.float32)

    # Hoisted param prep (built once), then the pallas_call.
    w_sel, b2d = make_grouped_fc_params(weight, bias)
    out = grouped_fc_apply(x, w_sel, b2d)
    out = jax.block_until_ready(out)

    # Pure-JAX reference replicating the PyTorch graph (full matmul + diagonal),
    # at matching (HIGHEST) precision.
    ref_full = jnp.matmul(x, weight, precision=jax.lax.Precision.HIGHEST) + bias
    ref = jnp.diagonal(ref_full, axis1=1, axis2=2)       # (B, G)
    assert out.shape == (B, G)
    assert jnp.allclose(out, ref, atol=1e-5, rtol=1e-5), "mismatch vs reference"

    print("KERNEL_OK")
</pallas_src>

<mosaic_0001>
module attributes {stable_mosaic.version = 11 : i64} {
  func.func @grouped_fc_kernel(%arg0: i32, %arg1: memref<8x256xf32, #tpu.memory_space<vmem>>, %arg2: memref<256x8xf32, #tpu.memory_space<vmem>>, %arg3: memref<1x8xf32, #tpu.memory_space<vmem>>, %arg4: memref<8x8xf32, #tpu.memory_space<vmem>>) attributes {dimension_semantics = [#tpu.dimension_semantics<parallel>], iteration_bounds = array<i64: 2>, scalar_prefetch = 0 : i64, scratch_operands = 0 : i64, tpu.core_type = #tpu.core_type<tc>, window_params = [{transform_indices = @transform_0, window_bounds = array<i64: 8, 256>}, {pipeline_mode = #tpu.pipeline_mode<synchronous>, transform_indices = @transform_1, window_bounds = array<i64: 256, 8>}, {pipeline_mode = #tpu.pipeline_mode<synchronous>, transform_indices = @transform_2, window_bounds = array<i64: 1, 8>}, {transform_indices = @transform_3, window_bounds = array<i64: 8, 8>}]} {
    %c0 = arith.constant 0 : index
    %c0_0 = arith.constant 0 : index
    %0 = vector.load %arg1[%c0, %c0_0] : memref<8x256xf32, #tpu.memory_space<vmem>>, vector<8x256xf32>
    %c0_1 = arith.constant 0 : index
    %c0_2 = arith.constant 0 : index
    %1 = vector.load %arg2[%c0_1, %c0_2] : memref<256x8xf32, #tpu.memory_space<vmem>>, vector<256x8xf32>
    %cst = arith.constant dense<0.000000e+00> : vector<8x8xf32>
    %2 = tpu.matmul %0, %1, %cst {dimension_numbers = #tpu.dot_dimension_numbers<[1], [0], [0], [1], [0, 0, 1, 1], [], []>, precision = #tpu.contract_precision<fp32>} : vector<8x256xf32>, vector<256x8xf32>, vector<8x8xf32> -> vector<8x8xf32>
    %c0_3 = arith.constant 0 : index
    %c0_4 = arith.constant 0 : index
    %3 = vector.load %arg3[%c0_3, %c0_4] : memref<1x8xf32, #tpu.memory_space<vmem>>, vector<1x8xf32>
    %4 = vector.broadcast %3 : vector<1x8xf32> to vector<8x8xf32>
    %5 = arith.addf %2, %4 : vector<8x8xf32>
    %c0_5 = arith.constant 0 : index
    %c0_6 = arith.constant 0 : index
    %6 = vector.load %arg4[%c0_5, %c0_6] : memref<8x8xf32, #tpu.memory_space<vmem>>, vector<8x8xf32>
    tpu.vector_store %arg4[%c0_5, %c0_6], %5 {strides = array<i32>} : memref<8x8xf32, #tpu.memory_space<vmem>>, vector<8x8xf32>,
    return
  }
  func.func @transform_0(%arg0: i32) -> (i32, i32) {
    %c0_i32 = arith.constant 0 : i32
    %c0_i32_0 = arith.constant 0 : i32
    return %arg0, %c0_i32 : i32, i32
  }
  func.func @transform_1(%arg0: i32) -> (i32, i32) {
    %c0_i32 = arith.constant 0 : i32
    %c0_i32_0 = arith.constant 0 : i32
    %c0_i32_1 = arith.constant 0 : i32
    return %c0_i32, %c0_i32_0 : i32, i32
  }
  func.func @transform_2(%arg0: i32) -> (i32, i32) {
    %c0_i32 = arith.constant 0 : i32
    %c0_i32_0 = arith.constant 0 : i32
    %c0_i32_1 = arith.constant 0 : i32
    return %c0_i32, %c0_i32_0 : i32, i32
  }
  func.func @transform_3(%arg0: i32) -> (i32, i32) {
    %c0_i32 = arith.constant 0 : i32
    %c0_i32_0 = arith.constant 0 : i32
    return %arg0, %c0_i32 : i32, i32
  }
}

</mosaic_0001>

<bundles_post_ra>
// kernel: tpu_custom_call.1
= control target key start
LH: loop header
LB: loop body
LE: loop exit
PB: predicated region body
PF: predicated region fallthrough
CT: control target
= control target key end

     0   :  { %s992_s12 = smov 0   ;;  %s1632_s0 = inlined_call_operand.vmem [shape: f32[16,256], index: 0, kind: input, shape index: {}]   ;;  %s1633_s1 = inlined_call_operand.vmem [shape: f32[256,8], index: 1, kind: input, shape index: {}]   ;;  %s1634_s2 = inlined_call_operand.vmem [shape: f32[1,8], index: 2, kind: input, shape index: {}]   ;;  %s1635_s3 = inlined_call_operand.vmem [shape: f32[16,8], index: 3, kind: output, shape index: {}]  }
   0x1 LB: > { %s944_s13 = sadd.s32 4294967295, %s970_s12   ;;  %p948_p0 = scmp.ge.s32.totalorder %s970_s12, 1  ;;  %s970_s12 = sphi %s992_s12, %s13_s12  }
   0x2   : > { %p137_p1 = scmp.lt.s32.totalorder %s970_s12, 3 }
   0x4   : > { %p138_p2 = pnand %p948_p0, %p137_p1 }
   0x6   : > { %141 = sbr.rel (%p138_p2) target bundleno = 253 (0xfd), region = 32 }
   0xb   : > { %v186_v0 = vld [vmem:[%s1633_s1 + $0x78] sm:$0xff]  ;;  %v185_v1 = vld [vmem:[%s1633_s1 + $0x70] sm:$0xff]  ;;  %v184_v2 = vld [vmem:[%s1633_s1 + $0x68] sm:$0xff]  ;;  %p1265_p3 = scmp.lt.s32.totalorder %s944_s13, 1  ;;  %vm889_vm0 = vcmask 64512  }
   0xc   : > { %v1009_v3 = vand.u32 4294901760, %v186_v0  ;;  %v1011_v4 = vand.u32 4294901760, %v185_v1  ;;  %v1013_v5 = vand.u32 4294901760, %v184_v2  ;;  %v183_v6 = vld [vmem:[%s1633_s1 + $0x60] sm:$0xff]  ;;  %v182_v7 = vld [vmem:[%s1633_s1 + $0x58] sm:$0xff]  ;;  %v181_v8 = vld [vmem:[%s1633_s1 + $0x50] sm:$0xff] }
   0xd   : > { %v1024_v9 = vand.u32 4294901760, %v183_v6  ;;  %v1026_v10 = vand.u32 4294901760, %v182_v7  ;;  %v1028_v11 = vand.u32 4294901760, %v181_v8  ;;  %v180_v12 = vld [vmem:[%s1633_s1 + $0x48] sm:$0xff]  ;;  %v179_v13 = vld [vmem:[%s1633_s1 + $0x40] sm:$0xff]  ;;  %v178_v21 = vld [vmem:[%s1633_s1 + $0x38] sm:$0xff] }
   0xe   : > { %208 = vmatpush.msra.mxu0 %v1009_v3  ;;  %v1038_v14 = vsub.f32 %v186_v0, %v1009_v3  ;;  %v1041_v15 = vsub.f32 %v185_v1, %v1011_v4  ;;  %404 = vmatpush.msra.mxu3 %v1009_v3  ;;  %v1045_v16 = vsub.f32 %v184_v2, %v1013_v5  ;;  %v1047_v17 = vand.u32 4294901760, %v180_v12  ;;  %v177_v26 = vld [vmem:[%s1633_s1 + $0x30] sm:$0xff]  ;;  %v176_v36 = vld [vmem:[%s1633_s1 + $0x28] sm:$0xff]  ;;  %v175_v42 = vld [vmem:[%s1633_s1 + $0x20] sm:$0xff]  ;;  %s1692_s13 = smov (!%p1265_p3, %s944_s13), 1 }
   0xf   : > { %v1050_v18 = vsub.f32 %v183_v6, %v1024_v9  ;;  %v1053_v19 = vsub.f32 %v182_v7, %v1026_v10  ;;  %v1056_v20 = vsub.f32 %v181_v8, %v1028_v11  ;;  %v1066_v25 = vand.u32 4294901760, %v179_v13  ;;  %v174_v47 = vld [vmem:[%s1633_s1 + $0x18] sm:$0xff]  ;;  %v173_v54 = vld [vmem:[%s1633_s1 + $0x10] sm:$0xff]  ;;  %v172_v61 = vld [vmem:[%s1633_s1 + $0x8] sm:$0xff]  ;;  %s954_s19 = sshll.u32 %s1692_s13, 4  ;;  %s951_s8 = sshll.u32 %s1692_s13, 3 }
  0x10   : > { %210 = vmatpush.msra.mxu0 %v1011_v4  ;;  %351 = vmatpush.msra.mxu2 %v1038_v14  ;;  %v250_v22 = vand.u32 4294901760, %v1038_v14  ;;  %v1651_v23 = vand.u32 4294901760, %v1041_v15  ;;  %v1649_v24 = vand.u32 4294901760, %v1045_v16  ;;  %v1075_v29 = vsub.f32 %v180_v12, %v1047_v17  ;;  %v202_v59 = vld [vmem:[%s1633_s1 + $0xf8] sm:$0xff]  ;;  %v171_v2 = vld [vmem:[%s1633_s1] sm:$0xff]  ;;  %v201_v6 = vld [vmem:[%s1633_s1 + $0xf0] sm:$0xff]  ;;  %s1371_s24 = scalar_lea.vmem %s1632_s0, %s954_s19  ;;  %s168_s11 = scalar_lea.vmem %s1635_s3, %s951_s8 }
  0x11   : > { %406 = vmatpush.msra.mxu3 %v1011_v4  ;;  %v1648_v27 = vand.u32 4294901760, %v1050_v18  ;;  %v1645_v28 = vand.u32 4294901760, %v1053_v19  ;;  %v1088_v33 = vand.u32 4294901760, %v178_v21  ;;  %v1091_v34 = vand.u32 4294901760, %v177_v26 }
  0x12   : > { %212 = vmatpush.msra.mxu0 %v1013_v5  ;;  %354 = vmatpush.msra.mxu2 %v1041_v15  ;;  %v251_v30 = vsub.f32 %v1038_v14, %v250_v22  ;;  %v257_v31 = vsub.f32 %v1041_v15, %v1651_v23  ;;  %v263_v32 = vsub.f32 %v1045_v16, %v1649_v24  ;;  %v1643_v35 = vand.u32 4294901760, %v1056_v20 }
  0x13   : > { %408 = vmatpush.msra.mxu3 %v1013_v5  ;;  %v269_v39 = vsub.f32 %v1050_v18, %v1648_v27  ;;  %v1103_v40 = vsub.f32 %v179_v13, %v1066_v25  ;;  %v275_v41 = vsub.f32 %v1053_v19, %v1645_v28  ;;  %v1113_v44 = vand.u32 4294901760, %v176_v36 }
  0x14   : > { %214 = vmatpush.msra.mxu0 %v1024_v9  ;;  %v252_v37 = vand.u32 4294901760, %v251_v30  ;;  %357 = vmatpush.msra.mxu2 %v1045_v16  ;;  %v258_v38 = vand.u32 4294901760, %v257_v31  ;;  %v264_v43 = vand.u32 4294901760, %v263_v32  ;;  %v1642_v45 = vand.u32 4294901760, %v1075_v29  ;;  %v200_v32 = vld [vmem:[%s1633_s1 + $0xe8] sm:$0xff] }
  0x15   : > { %410 = vmatpush.msra.mxu3 %v1024_v9  ;;  %v1117_v46 = vsub.f32 %v178_v21, %v1088_v33  ;;  %v281_v48 = vsub.f32 %v1056_v20, %v1643_v35  ;;  %v270_v49 = vand.u32 4294901760, %v269_v39  ;;  %v1128_v50 = vand.u32 4294901760, %v175_v42 }
  0x16   : > { %216 = vmatpush.msra.mxu0 %v1026_v10  ;;  %253 = vmatpush.msra.mxu1 %v252_v37  ;;  %v1641_v51 = vand.u32 4294901760, %v1103_v40  ;;  %v1132_v52 = vsub.f32 %v177_v26, %v1091_v34  ;;  %v1136_v53 = vand.u32 4294901760, %v174_v47  ;;  %v276_v55 = vand.u32 4294901760, %v275_v41 }
  0x17   : > { %360 = vmatpush.msra.mxu2 %v1050_v18  ;;  %412 = vmatpush.msra.mxu3 %v1026_v10  ;;  %v287_v56 = vsub.f32 %v1075_v29, %v1642_v45  ;;  %v1640_v57 = vand.u32 4294901760, %v1117_v46  ;;  %v1147_v58 = vsub.f32 %v176_v36, %v1113_v44  ;;  %v282_v60 = vand.u32 4294901760, %v281_v48  ;;  %v195_v45 = vld [vmem:[%s1633_s1 + $0xc0] sm:$0xff] }
  0x18   : > { %218 = vmatpush.msra.mxu0 %v1028_v11  ;;  %259 = vmatpush.msra.mxu1 %v258_v38  ;;  %v293_v62 = vsub.f32 %v1103_v40, %v1641_v51  ;;  %v1161_v63 = vand.u32 4294901760, %v173_v54  ;;  %v1639_v0 = vand.u32 4294901760, %v1132_v52  ;;  %v1165_v1 = vsub.f32 %v175_v42, %v1128_v50 }
  0x19   : > { %363 = vmatpush.msra.mxu2 %v1053_v19  ;;  %414 = vmatpush.msra.mxu3 %v1028_v11  ;;  %v1176_v7 = vsub.f32 %v174_v47, %v1136_v53  ;;  %v1178_v8 = vand.u32 4294901760, %v202_v59  ;;  %v288_v12 = vand.u32 4294901760, %v287_v56  ;;  %v299_v13 = vsub.f32 %v1117_v46, %v1640_v57 }
  0x1a   : > { %220 = vmatpush.msra.mxu0 %v1047_v17  ;;  %265 = vmatpush.msra.mxu1 %v264_v43  ;;  %v1184_v21 = vand.u32 4294901760, %v172_v61  ;;  %v1637_v26 = vand.u32 4294901760, %v1147_v58  ;;  %v1189_v30 = vand.u32 4294901760, %v171_v2  ;;  %v1191_v31 = vand.u32 4294901760, %v201_v6  ;;  %v199_v43 = vld [vmem:[%s1633_s1 + $0xe0] sm:$0xff] }
  0x1b   : > { %366 = vmatpush.msra.mxu2 %v1056_v20  ;;  %416 = vmatpush.msra.mxu3 %v1047_v17  ;;  %v294_v36 = vand.u32 4294901760, %v293_v62  ;;  %v305_v37 = vsub.f32 %v1132_v52, %v1639_v0  ;;  %v1636_v38 = vand.u32 4294901760, %v1165_v1  ;;  %v1202_v39 = vsub.f32 %v173_v54, %v1161_v63 }
  0x1c   : > { %222 = vmatpush.msra.mxu0 %v1066_v25  ;;  %271 = vmatpush.msra.mxu1 %v270_v49  ;;  %v1638_v41 = vand.u32 4294901760, %v1176_v7  ;;  %v1208_v42 = vsub.f32 %v202_v59, %v1178_v8  ;;  %v300_v47 = vand.u32 4294901760, %v299_v13  ;;  %v311_v48 = vsub.f32 %v1147_v58, %v1637_v26  ;;  %v198_v59 = vld [vmem:[%s1633_s1 + $0xd8] sm:$0xff]  ;;  %v197_v13 = vld [vmem:[%s1633_s1 + $0xd0] sm:$0xff] }
  0x1d   : > { %369 = vmatpush.msra.mxu2 %v1075_v29  ;;  %418 = vmatpush.msra.mxu3 %v1066_v25  ;;  %v1218_v49 = vsub.f32 %v172_v61, %v1184_v21  ;;  %v1220_v54 = vand.u32 4294901760, %v200_v32  ;;  %v1228_v56 = vsub.f32 %v201_v6, %v1191_v31  ;;  %v317_v61 = vsub.f32 %v1165_v1, %v1636_v38 }
  0x1e   : > { %224 = vmatpush.msra.mxu0 %v1088_v33  ;;  %277 = vmatpush.msra.mxu1 %v276_v55  ;;  %v1225_v55 = vsub.f32 %v171_v2, %v1189_v30  ;;  %v1644_v62 = vand.u32 4294901760, %v1202_v39  ;;  %v323_v2 = vsub.f32 %v1176_v7, %v1638_v41  ;;  %v1646_v6 = vand.u32 4294901760, %v1208_v42 }
  0x1f   : > { %372 = vmatpush.msra.mxu2 %v1103_v40  ;;  %420 = vmatpush.msra.mxu3 %v1088_v33  ;;  %1660 = vst [vmem:[#allocation2_spill] sm:$0xff] %v1220_v54  ;;  %v1252_v38 = vsub.f32 %v200_v32, %v1220_v54  ;;  %v1254_v26 = vand.u32 4294901760, %v198_v59  ;;  %v1650_v0 = vand.u32 4294901760, %v1228_v56  ;;  %v318_v32 = vand.u32 4294901760, %v317_v61 }
  0x20   : > { %226 = vmatpush.msra.mxu0 %v1091_v34  ;;  %283 = vmatpush.msra.mxu1 %v282_v60  ;;  %v306_v60 = vand.u32 4294901760, %v305_v37  ;;  %v1647_v37 = vand.u32 4294901760, %v1218_v49  ;;  %v1652_v41 = vand.u32 4294901760, %v1225_v55  ;;  %v1276_v51 = vand.u32 4294901760, %v197_v13 }
  0x21   : > { %375 = vmatpush.msra.mxu2 %v1117_v46  ;;  %422 = vmatpush.msra.mxu3 %v1091_v34  ;;  %v324_v35 = vand.u32 4294901760, %v323_v2  ;;  %v1653_v61 = vand.u32 4294901760, %v1252_v38  ;;  %v194_v2 = vld [vmem:[%s1633_s1 + $0xb8] sm:$0xff] }
  0x22   : > { %228 = vmatpush.msra.mxu0 %v1113_v44  ;;  %289 = vmatpush.msra.mxu1 %v288_v12  ;;  %v1238_v12 = vand.u32 4294901760, %v199_v43  ;;  %v1318_v24 = vsub.f32 %v197_v13, %v1276_v51  ;;  %v1323_v23 = vand.u32 4294901760, %v194_v2 }
  0x23   : > { %378 = vmatpush.msra.mxu2 %v1132_v52  ;;  %424 = vmatpush.msra.mxu3 %v1113_v44  ;;  %v604_v13 = vsub.f32 %v1252_v38, %v1653_v61 }
  0x24   : > { %230 = vmatpush.msra.mxu0 %v1128_v50  ;;  %295 = vmatpush.msra.mxu1 %v294_v36  ;;  %v312_v36 = vand.u32 4294901760, %v311_v48  ;;  %v329_v48 = vsub.f32 %v1202_v39, %v1644_v62  ;;  %v1274_v57 = vsub.f32 %v199_v43, %v1238_v12  ;;  %v335_v43 = vsub.f32 %v1218_v49, %v1647_v37 }
  0x25   : > { %381 = vmatpush.msra.mxu2 %v1147_v58  ;;  %426 = vmatpush.msra.mxu3 %v1128_v50  ;;  %v1292_v62 = vsub.f32 %v198_v59, %v1254_v26  ;;  %v341_v37 = vsub.f32 %v1225_v55, %v1652_v41 }
  0x26   : > { %232 = vmatpush.msra.mxu0 %v1136_v53  ;;  %301 = vmatpush.msra.mxu1 %v300_v47  ;;  %v196_v47 = vld [vmem:[%s1633_s1 + $0xc8] sm:$0xff]  ;;  %v330_v59 = vand.u32 4294901760, %v329_v48  ;;  %v1654_v27 = vand.u32 4294901760, %v1274_v57  ;;  %v336_v48 = vand.u32 4294901760, %v335_v43 }
  0x27   : > { %384 = vmatpush.msra.mxu2 %v1165_v1  ;;  %428 = vmatpush.msra.mxu3 %v1136_v53  ;;  %v1294_v28 = vand.u32 4294901760, %v196_v47  ;;  %v1655_v14 = vand.u32 4294901760, %v1292_v62  ;;  %v192_v43 = vld [vmem:[%s1633_s1 + $0xa8] sm:$0xff]  ;;  %v342_v61 = vand.u32 4294901760, %v341_v37  ;;  %v605_v37 = vand.u32 4294901760, %v604_v13 }
  0x28   : > { %234 = vmatpush.msra.mxu0 %v1161_v63  ;;  %307 = vmatpush.msra.mxu1 %v306_v60  ;;  %v592_v60 = vsub.f32 %v1208_v42, %v1646_v6  ;;  %v1304_v6 = vand.u32 4294901760, %v195_v45 }
  0x29   : > { %387 = vmatpush.msra.mxu2 %v1176_v7  ;;  %430 = vmatpush.msra.mxu3 %v1161_v63 }
  0x2a   : > { %236 = vmatpush.msra.mxu0 %v1184_v21  ;;  %313 = vmatpush.msra.mxu1 %v312_v36  ;;  %v598_v36 = vsub.f32 %v1228_v56, %v1650_v0  ;;  %v593_v0 = vand.u32 4294901760, %v592_v60  ;;  %v1662_v60 = vand.u32 4294901760, %v1041_v15  ;;  %v610_v15 = vsub.f32 %v1274_v57, %v1654_v27 }
  0x2b   : > { %390 = vmatpush.msra.mxu2 %v1202_v39  ;;  %432 = vmatpush.msra.mxu3 %v1184_v21  ;;  %v616_v27 = vsub.f32 %v1292_v62, %v1655_v14 }
  0x2c   : > { %238 = vmatpush.msra.mxu0 %v1189_v30  ;;  %319 = vmatpush.msra.mxu1 %v318_v32  ;;  %v193_v32 = vld [vmem:[%s1633_s1 + $0xb0] sm:$0xff]  ;;  %v599_v41 = vand.u32 4294901760, %v598_v36  ;;  %v1356_v36 = vsub.f32 %v194_v2, %v1323_v23  ;;  %v611_v13 = vand.u32 4294901760, %v610_v15 }
  0x2d   : > { %393 = vmatpush.msra.mxu2 %v1218_v49  ;;  %434 = vmatpush.msra.mxu3 %v1189_v30  ;;  %v617_v15 = vand.u32 4294901760, %v616_v27  ;;  %v189_v27 = vld [vmem:[%s1633_s1 + $0x90] sm:$0xff] }
  0x2e   : > { %445 = vmatpush.msrb.mxu0 %v250_v22  ;;  %325 = vmatpush.msra.mxu1 %v324_v35  ;;  %v1334_v22 = vsub.f32 %v196_v47, %v1294_v28  ;;  %v1340_v35 = vsub.f32 %v195_v45, %v1304_v6  ;;  %v1663_v45 = vand.u32 4294901760, %v1045_v16  ;;  %v1366_v16 = vand.u32 4294901760, %v192_v43 }
  0x2f   : > { %396 = vmatpush.msra.mxu2 %v1225_v55  ;;  %594 = vmatpush.msrb.mxu3 %v593_v0  ;;  %v1664_v0 = vand.u32 4294901760, %v1050_v18 }
  0x30   : > { %449 = vmatpush.msrb.mxu0 %v1662_v60  ;;  %331 = vmatpush.msra.mxu1 %v330_v59  ;;  %v1351_v60 = vand.u32 4294901760, %v193_v32  ;;  %v191_v59 = vld [vmem:[%s1633_s1 + $0xa0] sm:$0xff]  ;;  %v1667_v2 = vand.u32 4294901760, %v1334_v22 }
  0x31   : > { %549 = vmatpush.msrb.mxu2 %v1178_v8  ;;  %600 = vmatpush.msrb.mxu3 %v599_v41  ;;  %v1386_v18 = vand.u32 4294901760, %v191_v59  ;;  %v1666_v41 = vand.u32 4294901760, %v1053_v19  ;;  %v1668_v19 = vand.u32 4294901760, %v1056_v20 }
  0x32   : > { %453 = vmatpush.msrb.mxu0 %v1663_v45  ;;  %337 = vmatpush.msra.mxu1 %v336_v48  ;;  %v190_v48 = vld [vmem:[%s1633_s1 + $0x98] sm:$0xff]  ;;  %v1665_v45 = vand.u32 4294901760, %v1318_v24  ;;  %v1384_v47 = vsub.f32 %v193_v32, %v1351_v60  ;;  %v1398_v32 = vsub.f32 %v192_v43, %v1366_v16 }
  0x33   : > { %551 = vmatpush.msrb.mxu2 %v1191_v31  ;;  %606 = vmatpush.msrb.mxu3 %v605_v37 }
  0x34   : > { %457 = vmatpush.msrb.mxu0 %v1664_v0  ;;  %343 = vmatpush.msra.mxu1 %v342_v61  ;;  %v622_v14 = vsub.f32 %v1318_v24, %v1665_v45  ;;  %v1658_v0 = vand.u32 4294901760, %v1356_v36  ;;  %v169_v61 = vld [vmem:[%s1371_s24] sm:$0xff]  ;;  %v628_v45 = vsub.f32 %v1334_v22, %v1667_v2  ;;  %v1659_v37 = vand.u32 4294901760, %v1384_v47 }
  0x35   : > { %553 = vmatpush.msrb.mxu2 %v1220_v54  ;;  %v1400_v54 = vand.u32 4294901760, %v190_v48  ;;  %612 = vmatpush.msrb.mxu3 %v611_v13  ;;  %v1414_v2 = vsub.f32 %v191_v59, %v1386_v18  ;;  %v1416_v20 = vand.u32 4294901760, %v169_v61  ;;  %v651_v13 = vand.u32 4294901760, %v1398_v32 }
  0x36   : > { %461 = vmatpush.msrb.mxu0 %v1666_v41  ;;  %512 = vmatpush.msrb.mxu1 %v1009_v3  ;;  %v1669_v3 = vand.u32 4294901760, %v1340_v35  ;;  %v623_v43 = vand.u32 4294901760, %v622_v14  ;;  %v188_v14 = vld [vmem:[%s1633_s1 + $0x88] sm:$0xff]  ;;  %v629_v59 = vand.u32 4294901760, %v628_v45 }
  0x37   : > { %555 = vmatpush.msrb.mxu2 %v1238_v12  ;;  %618 = vmatpush.msrb.mxu3 %v617_v15  ;;  %v646_v15 = vsub.f32 %v1384_v47, %v1659_v37  ;;  %v1446_v45 = vsub.f32 %v169_v61, %v1416_v20 }
  0x38   : > { %465 = vmatpush.msrb.mxu0 %v1668_v19  ;;  %514 = vmatpush.msrb.mxu1 %v1011_v4  ;;  %v634_v41 = vsub.f32 %v1340_v35, %v1669_v3  ;;  %v1670_v4 = vand.u32 4294901760, %v1075_v29  ;;  %v640_v19 = vsub.f32 %v1356_v36, %v1658_v0  ;;  %v1429_v3 = vand.u32 4294901760, %v189_v27  ;;  %v187_v0 = vld [vmem:[%s1633_s1 + $0x80] sm:$0xff] }
  0x39   : > { %557 = vmatpush.msrb.mxu2 %v1254_v26  ;;  %v1432_v29 = vsub.f32 %v190_v48, %v1400_v54  ;;  %624 = vmatpush.msrb.mxu3 %v623_v43  ;;  %v657_v48 = vand.u32 4294901760, %v1414_v2  ;;  %v652_v43 = vsub.f32 %v1398_v32, %v651_v13  ;;  %v1461_v37 = vand.u32 4294901760, %v187_v0 }
  0x3a   : > { %469 = vmatpush.msrb.mxu0 %v1670_v4  ;;  %516 = vmatpush.msrb.mxu1 %v1013_v5  ;;  %v1671_v5 = vand.u32 4294901760, %v1103_v40  ;;  %v635_v4 = vand.u32 4294901760, %v634_v41  ;;  %v1448_v40 = vand.u32 4294901760, %v188_v14  ;;  %v641_v41 = vand.u32 4294901760, %v640_v19 }
  0x3b   : > { %559 = vmatpush.msrb.mxu2 %v1276_v51  ;;  %630 = vmatpush.msrb.mxu3 %v629_v59  ;;  %v1459_v61 = vsub.f32 %v189_v27, %v1429_v3  ;;  %v658_v19 = vsub.f32 %v1414_v2, %v657_v48  ;;  %v241_v59 = vand.u32 4294901760, %v1446_v45 }
  0x3c   : > { %473 = vmatpush.msrb.mxu0 %v1671_v5  ;;  %518 = vmatpush.msrb.mxu1 %v1024_v9  ;;  %v1672_v9 = vand.u32 4294901760, %v1117_v46  ;;  %v663_v5 = vand.u32 4294901760, %v1432_v29  ;;  %v1673_v46 = vand.u32 4294901760, %v1132_v52  ;;  %v1472_v27 = vsub.f32 %v188_v14, %v1448_v40 }
  0x3d   : > { %561 = vmatpush.msrb.mxu2 %v1294_v28  ;;  %636 = vmatpush.msrb.mxu3 %v635_v4  ;;  %v669_v4 = vand.u32 4294901760, %v1459_v61  ;;  %v1675_v14 = vand.u32 4294901760, %v1165_v1 }
  0x3e   : > { %477 = vmatpush.msrb.mxu0 %v1672_v9  ;;  %520 = vmatpush.msrb.mxu1 %v1026_v10  ;;  %v647_v10 = vand.u32 4294901760, %v646_v15  ;;  %v1674_v9 = vand.u32 4294901760, %v1147_v58  ;;  %v664_v52 = vsub.f32 %v1432_v29, %v663_v5  ;;  %v1483_v15 = vsub.f32 %v187_v0, %v1461_v37  ;;  %v170_v58 = vld [vmem:[%s1371_s24 + $0x8] sm:$0xff] }
  0x3f   : > { %563 = vmatpush.msrb.mxu2 %v1304_v6  ;;  %642 = vmatpush.msrb.mxu3 %v641_v41  ;;  %v242_v41 = vsub.f32 %v1446_v45, %v241_v59  ;;  %v1496_v0 = vand.u32 4294901760, %v170_v58 }
  0x40   : > { %481 = vmatpush.msrb.mxu0 %v1673_v46  ;;  %522 = vmatpush.msrb.mxu1 %v1028_v11  ;;  %v653_v11 = vand.u32 4294901760, %v652_v43  ;;  %v675_v43 = vand.u32 4294901760, %v1472_v27  ;;  %v1676_v46 = vand.u32 4294901760, %v1176_v7  ;;  %v665_v1 = vand.u32 4294901760, %v664_v52 }
  0x41   : > { %565 = vmatpush.msrb.mxu2 %v1323_v23  ;;  %648 = vmatpush.msrb.mxu3 %v647_v10  ;;  %v681_v10 = vand.u32 4294901760, %v1483_v15  ;;  %v1679_v52 = vand.u32 4294901760, %v1225_v55  ;;  %v1683_v55 = vand.u32 4294901760, %v1274_v57 }
  0x42   : > { %485 = vmatpush.msrb.mxu0 %v1674_v9  ;;  %524 = vmatpush.msrb.mxu1 %v1047_v17  ;;  %v659_v17 = vand.u32 4294901760, %v658_v19  ;;  %v1677_v19 = vand.u32 4294901760, %v1202_v39  ;;  %v676_v7 = vsub.f32 %v1472_v27, %v675_v43  ;;  %v1678_v9 = vand.u32 4294901760, %v1218_v49 }
  0x43   : > { %567 = vmatpush.msrb.mxu2 %v1351_v60  ;;  %654 = vmatpush.msrb.mxu3 %v653_v11  ;;  %v1517_v11 = vsub.f32 %v170_v58, %v1496_v0 }
  0x44   : > { %489 = vmatpush.msrb.mxu0 %v1675_v14  ;;  %526 = vmatpush.msrb.mxu1 %v1066_v25  ;;  %v670_v25 = vsub.f32 %v1459_v61, %v669_v4 }
  0x45   : > { %569 = vmatpush.msrb.mxu2 %v1366_v16  ;;  %660 = vmatpush.msrb.mxu3 %v659_v17  ;;  %v582_v14 = vand.u32 4294901760, %v1517_v11 }
  0x46   : > { %493 = vmatpush.msrb.mxu0 %v1676_v46  ;;  %528 = vmatpush.msrb.mxu1 %v1088_v33  ;;  %v243_v33 = vand.u32 4294901760, %v242_v41  ;;  %v671_v39 = vand.u32 4294901760, %v670_v25 }
  0x47   : > { %571 = vmatpush.msrb.mxu2 %v1386_v18  ;;  %666 = vmatpush.msrb.mxu3 %v665_v1 }
  0x48   : > { %497 = vmatpush.msrb.mxu0 %v1677_v19  ;;  %530 = vmatpush.msrb.mxu1 %v1091_v34  ;;  %v682_v34 = vsub.f32 %v1483_v15, %v681_v10 }
  0x49   : > { %573 = vmatpush.msrb.mxu2 %v1400_v54  ;;  %244 = vmatmul.f32.vlgmr.msra.gmra.mxu0 %v243_v33 }
  0x4a   : > { %501 = vmatpush.msrb.mxu0 %v1678_v9  ;;  %532 = vmatpush.msrb.mxu1 %v1113_v44  ;;  %v677_v44 = vand.u32 4294901760, %v676_v7  ;;  %v683_v49 = vand.u32 4294901760, %v682_v34 }
  0x4b   : > { %575 = vmatpush.msrb.mxu2 %v1429_v3  ;;  %672 = vmatpush.msrb.mxu3 %v671_v39 }
  0x4c   : > { %505 = vmatpush.msrb.mxu0 %v1679_v52  ;;  %534 = vmatpush.msrb.mxu1 %v1128_v50  ;;  %v1680_v50 = vand.u32 4294901760, %v1208_v42 }
  0x4d   : > { %577 = vmatpush.msrb.mxu2 %v1448_v40  ;;  %678 = vmatpush.msrb.mxu3 %v677_v44 }
  0x4e   : > { %692 = vmatpush.msra.mxu0 %v1208_v42  ;;  %536 = vmatpush.msrb.mxu1 %v1136_v53  ;;  %v583_v53 = vsub.f32 %v1517_v11, %v582_v14 }
  0x4f   : > { %579 = vmatpush.msrb.mxu2 %v1461_v37  ;;  %684 = vmatpush.msrb.mxu3 %v683_v49 }
  0x50   : > { %695 = vmatpush.msra.mxu0 %v1228_v56  ;;  %538 = vmatpush.msrb.mxu1 %v1161_v63  ;;  %v1681_v63 = vand.u32 4294901760, %v1228_v56  ;;  %v584_v42 = vand.u32 4294901760, %v583_v53 }
  0x51   : > { %399 = vmatmul.f32.vlgmr.msra.gmra.mxu2 %v1446_v45  ;;  %438 = vmatmul.f32.vlgmr.msra.gmra.mxu3 %v241_v59 }
  0x52   : > { %698 = vmatpush.msra.mxu0 %v1252_v38  ;;  %786 = vmatpush.msra.mxu2 %v1680_v50 }
  0x53   : > { %540 = vmatpush.msrb.mxu1 %v1184_v21  ;;  %853 = vmatpush.msra.mxu3 %v1178_v8  ;;  %v1682_v21 = vand.u32 4294901760, %v1252_v38  ;;  %v1685_v38 = vand.u32 4294901760, %v1292_v62 }
  0x54   : > { %701 = vmatpush.msra.mxu0 %v1274_v57  ;;  %790 = vmatpush.msra.mxu2 %v1681_v63  ;;  %v1686_v57 = vand.u32 4294901760, %v1318_v24 }
  0x55   : > { %542 = vmatpush.msrb.mxu1 %v1189_v30  ;;  %855 = vmatpush.msra.mxu3 %v1191_v31  ;;  %v1684_v30 = vld [vmem:[#allocation2_spill] sm:$0xff] }
  0x56   : > { %704 = vmatpush.msra.mxu0 %v1292_v62  ;;  %345 = vmatmul.f32.vlgmr.msra.gmra.mxu1 %v1416_v20 }
  0x57   : > { %794 = vmatpush.msra.mxu2 %v1682_v21  ;;  %745 = vmatpush.msra.mxu1 %v1178_v8  ;;  %v1687_v8 = vand.u32 4294901760, %v1334_v22 }
  0x58   : > { %707 = vmatpush.msra.mxu0 %v1318_v24  ;;  %857 = vmatpush.msra.mxu3 %v1684_v30  ;;  %v1688_v24 = vand.u32 4294901760, %v1340_v35 }
  0x59   : > { %798 = vmatpush.msra.mxu2 %v1683_v55  ;;  %747 = vmatpush.msra.mxu1 %v1191_v31 }
  0x5a   : > { %585 = vmatmul.f32.vlgmr.msrb.gmra.mxu2 %v584_v42  ;;  %710 = vmatpush.msra.mxu0 %v1334_v22 }
  0x5b   : > { %749 = vmatpush.msra.mxu1 %v1684_v30  ;;  %802 = vmatpush.msra.mxu2 %v1685_v38 }
  0x5c   : > { %859 = vmatpush.msra.mxu3 %v1238_v12  ;;  %507 = vmatmul.f32.vlgmr.msrb.gmra.mxu0 %v1416_v20 }
  0x5d   : > { %686 = vmatmul.f32.vlgmr.msrb.gmra.mxu3 %v1496_v0  ;;  %713 = vmatpush.msra.mxu0 %v1340_v35 }
  0x5e   : > { %751 = vmatpush.msra.mxu1 %v1238_v12  ;;  %806 = vmatpush.msra.mxu2 %v1686_v57 }
  0x5f   : > { %861 = vmatpush.msra.mxu3 %v1254_v26  ;;  %544 = vmatmul.f32.vlgmr.msrb.gmra.mxu1 %v1416_v20 }
  0x60   : > { %716 = vmatpush.msra.mxu0 %v1356_v36  ;;  %753 = vmatpush.msra.mxu1 %v1254_v26  ;;  %v1689_v26 = vand.u32 4294901760, %v1356_v36 }
  0x61   : > { %810 = vmatpush.msra.mxu2 %v1687_v8  ;;  %863 = vmatpush.msra.mxu3 %v1276_v51 }
  0x62   : > { %719 = vmatpush.msra.mxu0 %v1384_v47  ;;  %755 = vmatpush.msra.mxu1 %v1276_v51  ;;  %v1690_v51 = vand.u32 4294901760, %v1384_v47 }
  0x63   : > { %814 = vmatpush.msra.mxu2 %v1688_v24  ;;  %865 = vmatpush.msra.mxu3 %v1294_v28 }
  0x64   : > { %722 = vmatpush.msra.mxu0 %v1398_v32  ;;  %757 = vmatpush.msra.mxu1 %v1294_v28 }
  0x65   : > { %818 = vmatpush.msra.mxu2 %v1689_v26  ;;  %867 = vmatpush.msra.mxu3 %v1304_v6 }
  0x66   : > { %725 = vmatpush.msra.mxu0 %v1414_v2  ;;  %759 = vmatpush.msra.mxu1 %v1304_v6 }
  0x67   : > { %822 = vmatpush.msra.mxu2 %v1690_v51  ;;  %869 = vmatpush.msra.mxu3 %v1323_v23 }
  0x68   : > { %728 = vmatpush.msra.mxu0 %v1432_v29  ;;  %761 = vmatpush.msra.mxu1 %v1323_v23  ;;  %v963_v23 = vld [vmem:[%s1634_s2] ss:$0 sm:$0xff] }
  0x69   : > { %826 = vmatpush.msra.mxu2 %v651_v13  ;;  %871 = vmatpush.msra.mxu3 %v1351_v60 }
  0x6a   : > { %731 = vmatpush.msra.mxu0 %v1459_v61  ;;  %763 = vmatpush.msra.mxu1 %v1351_v60 }
  0x6b   : > { %830 = vmatpush.msra.mxu2 %v657_v48  ;;  %873 = vmatpush.msra.mxu3 %v1366_v16 }
  0x6c   : > { %734 = vmatpush.msra.mxu0 %v1472_v27  ;;  %765 = vmatpush.msra.mxu1 %v1366_v16 }
  0x6d   : > { %834 = vmatpush.msra.mxu2 %v663_v5  ;;  %875 = vmatpush.msra.mxu3 %v1386_v18 }
  0x6e   : > { %737 = vmatpush.msra.mxu0 %v1483_v15  ;;  %767 = vmatpush.msra.mxu1 %v1386_v18 }
  0x6f   : > { %838 = vmatpush.msra.mxu2 %v669_v4  ;;  %877 = vmatpush.msra.mxu3 %v1400_v54 }
  0x70   : > { %740 = vmatmul.f32.vlgmr.msra.gmra.mxu0 %v1517_v11  ;;  %769 = vmatpush.msra.mxu1 %v1400_v54 }
  0x71   : > { %842 = vmatpush.msra.mxu2 %v675_v43  ;;  %879 = vmatpush.msra.mxu3 %v1429_v3 }
  0x72   : > { %771 = vmatpush.msra.mxu1 %v1429_v3 }
  0x73   : > { %846 = vmatpush.msra.mxu2 %v681_v10  ;;  %881 = vmatpush.msra.mxu3 %v1448_v40 }
  0x74   : > { %848 = vmatmul.f32.vlgmr.msra.gmra.mxu2 %v1496_v0  ;;  %773 = vmatpush.msra.mxu1 %v1448_v40 }
  0x75   : > { %883 = vmatpush.msra.mxu3 %v1461_v37 }
  0x76   : > { %885 = vmatmul.f32.vlgmr.msra.gmra.mxu3 %v1496_v0  ;;  %775 = vmatpush.msra.mxu1 %v1461_v37 }
  0x77   : > { %779 = vmatmul.f32.vlgmr.msra.gmra.mxu1 %v582_v14 }
  0xc6   : > { %v245_v28 = vpop.f32.mrf.mxu0 }
  0xc7   : > { %v246_v31 = vadd.f32 %v963_v23, %v245_v28 }
  0xd3   : > { %v346_v54 = vpop.f32.mrf.mxu1 }
  0xd4   : > { %v347_v56 = vadd.f32 %v346_v54, %v246_v31  ;;  %v400_v62 = vpop.f32.mrf.mxu2  ;;  %v439_v6 = vpop.f32.mrf.mxu3 }
  0xd6   : > { %v401_v12 = vadd.f32 %v400_v62, %v347_v56 }
  0xd8   : > { %v440_v22 = vadd.f32 %v439_v6, %v401_v12 }
  0xd9   : > { %v508_v35 = vpop.f32.mrf.mxu0 }
  0xda   : > { %v509_v47 = vadd.f32 %v508_v35, %v440_v22 }
  0xdc   : > { %v545_v60 = vpop.f32.mrf.mxu1 }
  0xdd   : > { %v546_v36 = vadd.f32 %v545_v60, %v509_v47  ;;  %v586_v16 = vpop.f32.mrf.mxu2 }
  0xdf   : > { %v587_v18 = vadd.f32 %v586_v16, %v546_v36 }
  0xe0   : > { %v687_v32 = vpop.f32.mrf.mxu3 }
  0xe1   : > { %v688_v2 = vadd.f32 %v687_v32, %v587_v18 }
  0xed   : > { %v741_v37 = vpop.f32.mrf.mxu0 }
  0xee   : > { %v742_v20 = vadd.f32 %v741_v37, %v688_v2 }
  0xf4   : > { %v780_v13 = vpop.f32.mrf.mxu1 }
  0xf5   : > { %v781_v3 = vadd.f32 %v780_v13, %v742_v20 }
  0xf7   : > { %v849_v29 = vpop.f32.mrf.mxu2 }
  0xf8   : > { %v850_v48 = vadd.f32 %v849_v29, %v781_v3 }
  0xf9   : > { %v886_v45 = vpop.f32.mrf.mxu3 }
  0xfa   : > { %v887_v40 = vadd.f32 %v886_v45, %v850_v48 }
  0xfc   : > { %890 = vst.msk [vmem:[%s168_s11] sm:$0xff] %vm889_vm0, %v887_v40 }
  0xfd PF: > { %s13_s12 = sadd.s32 1, %s970_s12  }
  0xfe   : > { %p10_p4 = scmp.ge.s32.totalorder %s13_s12, 4  }
 0x100   :  { %12 = sbr.rel (!%p10_p4) target bundleno = 1 (0x1), region = 62 }

</bundles_post_ra>
